<compile_context>
chip_gen: v6e
topology: v6e:2x2x1
jax: 0.10.0
libtpu: 0.0.40
codegen_flags: <defaults>
</compile_context>

<pallas_src>
import functools

import jax
import jax.numpy as jnp
from jax.experimental import pallas as pl
from jax.experimental.pallas import tpu as pltpu


def _round_up(a: int, b: int) -> int:
    return (a + b - 1) // b * b


def _layer_norm(z, gamma, beta, d_actual: int, masked: bool):
    """LayerNorm over the last axis; statistics restricted to the first d_actual
    columns when the feature axis was zero-padded to a multiple of 128."""
    inv_d = 1.0 / d_actual
    if masked:
        mask = jax.lax.broadcasted_iota(jnp.int32, z.shape, 1) < d_actual
        mean = jnp.sum(jnp.where(mask, z, 0.0), axis=-1, keepdims=True) * inv_d
        cz = jnp.where(mask, z - mean, 0.0)
    else:
        mean = jnp.sum(z, axis=-1, keepdims=True) * inv_d
        cz = z - mean
    var = jnp.sum(cz * cz, axis=-1, keepdims=True) * inv_d
    zn = cz * jax.lax.rsqrt(var + 1e-5)       # eps matches nn.LayerNorm default
    return zn * gamma + beta


def _residual_fused_kernel(x_ref, w_ref, b_ref, g_ref, bt_ref, o_ref, *,
                           d_actual: int, masked: bool):
    """Single-pass path (weight fits in VMEM): grid is 1-D over row tiles."""
    x = x_ref[...]
    # sublayer: Linear(D, D) on the MXU, f32 accumulation.
    y = jnp.dot(x, w_ref[...], preferred_element_type=jnp.float32)
    y = y + b_ref[...].astype(jnp.float32)
    # Dropout in eval mode is identity; residual add in f32.
    # TODO(synk): training-mode dropout (pltpu.prng_random_bits) omitted.
    z = x.astype(jnp.float32) + y
    out = _layer_norm(z, g_ref[...].astype(jnp.float32),
                      bt_ref[...].astype(jnp.float32), d_actual, masked)
    o_ref[...] = out.astype(o_ref.dtype)


def _residual_ktiled_kernel(xk_ref, xf_ref, w_ref, b_ref, g_ref, bt_ref, o_ref,
                            acc_ref, *, d_actual: int, masked: bool):
    """Large-D path: grid = (row_tiles, k_tiles); axis 1 is the contraction."""
    k = pl.program_id(1)

    @pl.when(k == 0)
    def _init():
        acc_ref[...] = jnp.zeros_like(acc_ref)

    # Partial product on the MXU in native dtype, f32 accumulator.
    acc_ref[...] += jnp.dot(xk_ref[...], w_ref[...],
                            preferred_element_type=jnp.float32)

    @pl.when(k == pl.num_programs(1) - 1)
    def _epilogue():
        z = (xf_ref[...].astype(jnp.float32) + acc_ref[...]
             + b_ref[...].astype(jnp.float32))
        out = _layer_norm(z, g_ref[...].astype(jnp.float32),
                          bt_ref[...].astype(jnp.float32), d_actual, masked)
        o_ref[...] = out.astype(o_ref.dtype)


def residual_forward(x, w, b, gamma, beta, *, tile_rows=256, tile_k=512):
    """x: (B, S, D). w: (D, D) in PyTorch Linear layout (out, in). Returns (B, S, D)."""
    B, S, D = x.shape
    N = B * S
    itemsize = jnp.dtype(x.dtype).itemsize

    # --- tile sizes & padded shapes -----------------------------------------
    Dp = _round_up(D, 128)                       # lane-dense feature axis
    row_align = 16 if itemsize == 2 else 8       # bf16 packs 16 sublanes / vreg
    tm = min(_round_up(tile_rows, row_align), _round_up(N, row_align))
    Np = _round_up(N, tm)

    single_k = Dp <= max(tile_k, 128)
    if single_k:
        tk = Dp
    else:
        tk = 128
        for cand in (512, 256):
            if cand <= tile_k and Dp % cand == 0:
                tk = cand
                break

    # --- pad operands (zero padding is exact for the matmul; LN is masked) ---
    x2 = x.reshape(N, D)
    if Np != N or Dp != D:
        x2 = jnp.pad(x2, ((0, Np - N), (0, Dp - D)))
    # PyTorch Linear stores (out, in); the kernel computes x @ w_t with
    # w_t = (in, out).  For repeated calls, pre-transpose/pad once outside.
    w_t = w.T
    if Dp != D:
        w_t = jnp.pad(w_t, ((0, Dp - D), (0, Dp - D)))
        b_p = jnp.pad(b, (0, Dp - D))
        g_p = jnp.pad(gamma, (0, Dp - D))
        be_p = jnp.pad(beta, (0, Dp - D))
    else:
        b_p, g_p, be_p = b, gamma, beta
    b2 = b_p.reshape(1, Dp).astype(jnp.float32)
    g2 = g_p.reshape(1, Dp).astype(jnp.float32)
    be2 = be_p.reshape(1, Dp).astype(jnp.float32)

    w_itemsize = jnp.dtype(w_t.dtype).itemsize
    masked = Dp != D

    cost = pl.CostEstimate(
        flops=2 * N * D * D + 10 * N * D,
        transcendentals=N,
        bytes_accessed=2 * N * D * itemsize + D * D * w_itemsize + 3 * D * 4,
    )

    if single_k:
        # ----- fused single-pass kernel: 1-D grid over row tiles -------------
        vmem_need = (2 * tm * Dp * itemsize          # x tile (double buffered)
                     + 2 * Dp * Dp * w_itemsize      # resident weight
                     + 3 * 2 * Dp * 4                # bias / gamma / beta
                     + 2 * tm * Dp * itemsize        # output tile
                     + 4 * tm * Dp * 4)              # f32 temporaries headroom
        vmem_limit = int(min(64 * 1024 * 1024,
                             max(32 * 1024 * 1024, 2 * vmem_need)))
        kernel = functools.partial(_residual_fused_kernel,
                                   d_actual=D, masked=masked)
        out = pl.pallas_call(
            kernel,
            out_shape=jax.ShapeDtypeStruct((Np, Dp), x.dtype),
            grid_spec=pltpu.PrefetchScalarGridSpec(
                num_scalar_prefetch=0,
                grid=(Np // tm,),
                in_specs=[
                    pl.BlockSpec((tm, Dp), lambda i: (i, 0)),   # x row tile
                    pl.BlockSpec((Dp, Dp), lambda i: (0, 0)),   # weight (resident)
                    pl.BlockSpec((1, Dp), lambda i: (0, 0)),    # bias
                    pl.BlockSpec((1, Dp), lambda i: (0, 0)),    # LayerNorm gamma
                    pl.BlockSpec((1, Dp), lambda i: (0, 0)),    # LayerNorm beta
                ],
                out_specs=pl.BlockSpec((tm, Dp), lambda i: (i, 0)),
            ),
            compiler_params=pltpu.CompilerParams(
                dimension_semantics=("parallel",),
                vmem_limit_bytes=vmem_limit,
            ),
            cost_estimate=cost,
        )(x2, w_t, b2, g2, be2)
    else:
        # ----- K-tiled kernel: grid (row_tiles, k_tiles), f32 accumulator ----
        vmem_need = (2 * tm * tk * itemsize          # x K-chunk (double buffered)
                     + 2 * tm * Dp * itemsize        # x full row (residual)
                     + 2 * tk * Dp * w_itemsize      # weight tile
                     + 3 * 2 * Dp * 4                # bias / gamma / beta
                     + 2 * tm * Dp * itemsize        # output tile
                     + tm * Dp * 4)                  # f32 accumulator scratch
        vmem_limit = int(min(64 * 1024 * 1024,
                             max(32 * 1024 * 1024, 2 * vmem_need)))
        kernel = functools.partial(_residual_ktiled_kernel,
                                   d_actual=D, masked=masked)
        out = pl.pallas_call(
            kernel,
            out_shape=jax.ShapeDtypeStruct((Np, Dp), x.dtype),
            grid_spec=pltpu.PrefetchScalarGridSpec(
                num_scalar_prefetch=0,
                grid=(Np // tm, Dp // tk),
                in_specs=[
                    pl.BlockSpec((tm, tk), lambda i, k: (i, k)),   # x K-chunk (matmul)
                    pl.BlockSpec((tm, Dp), lambda i, k: (i, 0)),   # x full row (residual)
                    pl.BlockSpec((tk, Dp), lambda i, k: (k, 0)),   # weight tile
                    pl.BlockSpec((1, Dp), lambda i, k: (0, 0)),    # bias
                    pl.BlockSpec((1, Dp), lambda i, k: (0, 0)),    # LayerNorm gamma
                    pl.BlockSpec((1, Dp), lambda i, k: (0, 0)),    # LayerNorm beta
                ],
                out_specs=pl.BlockSpec((tm, Dp), lambda i, k: (i, 0)),
                scratch_shapes=[pltpu.VMEM((tm, Dp), jnp.float32)],
            ),
            compiler_params=pltpu.CompilerParams(
                dimension_semantics=("parallel", "arbitrary"),
                vmem_limit_bytes=vmem_limit,
            ),
            cost_estimate=cost,
        )(x2, x2, w_t, b2, g2, be2)

    return out[:N, :D].reshape(B, S, D)


def _reference(x, w, b, gamma, beta):
    y = jnp.einsum("bsd,od->bso", x, w) + b
    z = x + y
    mean = jnp.mean(z, axis=-1, keepdims=True)
    var = jnp.mean((z - mean) ** 2, axis=-1, keepdims=True)
    zn = (z - mean) / jnp.sqrt(var + 1e-5)
    return zn * gamma + beta


if __name__ == "__main__":
    key = jax.random.PRNGKey(0)
    kx, kw, kb = jax.random.split(key, 3)

    # Small shapes consistent with the encoder block: batch=2, seq=8, hidden=32.
    B, S, D = 2, 8, 32
    x = jax.random.normal(kx, (B, S, D), dtype=jnp.float32)
    w = jax.random.normal(kw, (D, D), dtype=jnp.float32) * (1.0 / jnp.sqrt(D))
    b = jax.random.normal(kb, (D,), dtype=jnp.float32) * 0.01
    gamma = jnp.linspace(0.5, 1.5, D, dtype=jnp.float32)
    beta = jnp.linspace(-0.1, 0.1, D, dtype=jnp.float32)

    out = jax.block_until_ready(residual_forward(x, w, b, gamma, beta))
    ref = _reference(x, w, b, gamma, beta)
    assert out.shape == (B, S, D)
    assert jnp.allclose(out, ref, atol=1e-4, rtol=1e-4), "fused path mismatch"

    # Also exercise the K-tiled (large-D) path at a still-small shape by
    # forcing a small K tile.
    D2 = 256
    x2 = jax.random.normal(kx, (B, S, D2), dtype=jnp.float32)
    w2 = jax.random.normal(kw, (D2, D2), dtype=jnp.float32) * (1.0 / jnp.sqrt(D2))
    b2 = jax.random.normal(kb, (D2,), dtype=jnp.float32) * 0.01
    g2 = jnp.ones((D2,), dtype=jnp.float32)
    be2 = jnp.zeros((D2,), dtype=jnp.float32)

    out2 = jax.block_until_ready(
        residual_forward(x2, w2, b2, g2, be2, tile_k=128))
    ref2 = _reference(x2, w2, b2, g2, be2)
    assert out2.shape == (B, S, D2)
    assert jnp.allclose(out2, ref2, atol=1e-3, rtol=1e-3), "ktiled path mismatch"

    print("KERNEL_OK")
</pallas_src>

<mosaic_0001>
module attributes {stable_mosaic.version = 11 : i64} {
  func.func @_residual_fused_kernel(%arg0: i32, %arg1: memref<16x128xf32, #tpu.memory_space<vmem>>, %arg2: memref<128x128xf32, #tpu.memory_space<vmem>>, %arg3: memref<1x128xf32, #tpu.memory_space<vmem>>, %arg4: memref<1x128xf32, #tpu.memory_space<vmem>>, %arg5: memref<1x128xf32, #tpu.memory_space<vmem>>, %arg6: memref<16x128xf32, #tpu.memory_space<vmem>>) attributes {dimension_semantics = [#tpu.dimension_semantics<parallel>], iteration_bounds = array<i64: 1>, scalar_prefetch = 0 : i64, scratch_operands = 0 : i64, tpu.core_type = #tpu.core_type<tc>, window_params = [{transform_indices = @transform_0, window_bounds = array<i64: 16, 128>}, {pipeline_mode = #tpu.pipeline_mode<synchronous>, transform_indices = @transform_1, window_bounds = array<i64: 128, 128>}, {pipeline_mode = #tpu.pipeline_mode<synchronous>, transform_indices = @transform_2, window_bounds = array<i64: 1, 128>}, {pipeline_mode = #tpu.pipeline_mode<synchronous>, transform_indices = @transform_3, window_bounds = array<i64: 1, 128>}, {pipeline_mode = #tpu.pipeline_mode<synchronous>, transform_indices = @transform_4, window_bounds = array<i64: 1, 128>}, {transform_indices = @transform_5, window_bounds = array<i64: 16, 128>}]} {
    %c0 = arith.constant 0 : index
    %c0_0 = arith.constant 0 : index
    %0 = vector.load %arg1[%c0, %c0_0] : memref<16x128xf32, #tpu.memory_space<vmem>>, vector<16x128xf32>
    %c0_1 = arith.constant 0 : index
    %c0_2 = arith.constant 0 : index
    %1 = vector.load %arg2[%c0_1, %c0_2] : memref<128x128xf32, #tpu.memory_space<vmem>>, vector<128x128xf32>
    %cst = arith.constant dense<0.000000e+00> : vector<16x128xf32>
    %2 = tpu.matmul %0, %1, %cst {dimension_numbers = #tpu.dot_dimension_numbers<[1], [0], [0], [1], [0, 0, 1, 1], [], []>} : vector<16x128xf32>, vector<128x128xf32>, vector<16x128xf32> -> vector<16x128xf32>
    %c0_3 = arith.constant 0 : index
    %c0_4 = arith.constant 0 : index
    %3 = vector.load %arg3[%c0_3, %c0_4] : memref<1x128xf32, #tpu.memory_space<vmem>>, vector<1x128xf32>
    %4 = vector.broadcast %3 : vector<1x128xf32> to vector<16x128xf32>
    %5 = arith.addf %2, %4 : vector<16x128xf32>
    %6 = arith.addf %0, %5 : vector<16x128xf32>
    %c0_5 = arith.constant 0 : index
    %c0_6 = arith.constant 0 : index
    %7 = vector.load %arg4[%c0_5, %c0_6] : memref<1x128xf32, #tpu.memory_space<vmem>>, vector<1x128xf32>
    %c0_7 = arith.constant 0 : index
    %c0_8 = arith.constant 0 : index
    %8 = vector.load %arg5[%c0_7, %c0_8] : memref<1x128xf32, #tpu.memory_space<vmem>>, vector<1x128xf32>
    %9 = tpu.iota {dimensions = array<i32: 1>} : vector<16x128xi32>
    %c32_i32 = arith.constant 32 : i32
    %10 = vector.broadcast %c32_i32 : i32 to vector<16x128xi32>
    %11 = arith.cmpi slt, %9, %10 : vector<16x128xi32>
    %cst_9 = arith.constant 0.000000e+00 : f32
    %12 = vector.broadcast %cst_9 : f32 to vector<16x128xf32>
    %13 = arith.select %11, %6, %12 : vector<16x128xi1>, vector<16x128xf32>
    %cst_10 = arith.constant dense<0.000000e+00> : vector<16xf32>
    %14 = vector.multi_reduction <add>, %13, %cst_10 [1] : vector<16x128xf32> to vector<16xf32>
    %15 = vector.shape_cast %14 : vector<16xf32> to vector<16x1xf32>
    %cst_11 = arith.constant 3.125000e-02 : f32
    %16 = vector.broadcast %cst_11 : f32 to vector<16x1xf32>
    %17 = arith.mulf %15, %16 : vector<16x1xf32>
    %18 = vector.broadcast %17 : vector<16x1xf32> to vector<16x128xf32>
    %19 = arith.subf %6, %18 : vector<16x128xf32>
    %cst_12 = arith.constant 0.000000e+00 : f32
    %20 = vector.broadcast %cst_12 : f32 to vector<16x128xf32>
    %21 = arith.select %11, %19, %20 : vector<16x128xi1>, vector<16x128xf32>
    %22 = arith.mulf %21, %21 : vector<16x128xf32>
    %cst_13 = arith.constant dense<0.000000e+00> : vector<16xf32>
    %23 = vector.multi_reduction <add>, %22, %cst_13 [1] : vector<16x128xf32> to vector<16xf32>
    %24 = vector.shape_cast %23 : vector<16xf32> to vector<16x1xf32>
    %cst_14 = arith.constant 3.125000e-02 : f32
    %25 = vector.broadcast %cst_14 : f32 to vector<16x1xf32>
    %26 = arith.mulf %24, %25 : vector<16x1xf32>
    %cst_15 = arith.constant 9.99999974E-6 : f32
    %27 = vector.broadcast %cst_15 : f32 to vector<16x1xf32>
    %28 = arith.addf %26, %27 : vector<16x1xf32>
    %29 = math.rsqrt %28 : vector<16x1xf32>
    %30 = vector.broadcast %29 : vector<16x1xf32> to vector<16x128xf32>
    %31 = arith.mulf %21, %30 : vector<16x128xf32>
    %32 = vector.broadcast %7 : vector<1x128xf32> to vector<16x128xf32>
    %33 = arith.mulf %31, %32 : vector<16x128xf32>
    %34 = vector.broadcast %8 : vector<1x128xf32> to vector<16x128xf32>
    %35 = arith.addf %33, %34 : vector<16x128xf32>
    %c0_16 = arith.constant 0 : index
    %c0_17 = arith.constant 0 : index
    %36 = vector.load %arg6[%c0_16, %c0_17] : memref<16x128xf32, #tpu.memory_space<vmem>>, vector<16x128xf32>
    tpu.vector_store %arg6[%c0_16, %c0_17], %35 {strides = array<i32>} : memref<16x128xf32, #tpu.memory_space<vmem>>, vector<16x128xf32>,
    return
  }
  func.func @transform_0(%arg0: i32) -> (i32, i32) {
    %c0_i32 = arith.constant 0 : i32
    %c0_i32_0 = arith.constant 0 : i32
    return %arg0, %c0_i32 : i32, i32
  }
  func.func @transform_1(%arg0: i32) -> (i32, i32) {
    %c0_i32 = arith.constant 0 : i32
    %c0_i32_0 = arith.constant 0 : i32
    %c0_i32_1 = arith.constant 0 : i32
    return %c0_i32, %c0_i32_0 : i32, i32
  }
  func.func @transform_2(%arg0: i32) -> (i32, i32) {
    %c0_i32 = arith.constant 0 : i32
    %c0_i32_0 = arith.constant 0 : i32
    %c0_i32_1 = arith.constant 0 : i32
    return %c0_i32, %c0_i32_0 : i32, i32
  }
  func.func @transform_3(%arg0: i32) -> (i32, i32) {
    %c0_i32 = arith.constant 0 : i32
    %c0_i32_0 = arith.constant 0 : i32
    %c0_i32_1 = arith.constant 0 : i32
    return %c0_i32, %c0_i32_0 : i32, i32
  }
  func.func @transform_4(%arg0: i32) -> (i32, i32) {
    %c0_i32 = arith.constant 0 : i32
    %c0_i32_0 = arith.constant 0 : i32
    %c0_i32_1 = arith.constant 0 : i32
    return %c0_i32, %c0_i32_0 : i32, i32
  }
  func.func @transform_5(%arg0: i32) -> (i32, i32) {
    %c0_i32 = arith.constant 0 : i32
    %c0_i32_0 = arith.constant 0 : i32
    return %arg0, %c0_i32 : i32, i32
  }
}

</mosaic_0001>

<bundles_post_ra>
// kernel: tpu_custom_call.1
= control target key start
LH: loop header
LB: loop body
LE: loop exit
PB: predicated region body
PF: predicated region fallthrough
CT: control target
= control target key end

     0   :  { %10 = vsyncpa [#allocation3], 0  ;;  %s411_s0 = inlined_call_operand.hbm [shape: f32[16,128], index: 0, kind: input, shape index: {}]   ;;  %s412_s1 = inlined_call_operand.hbm [shape: f32[128,128], index: 1, kind: input, shape index: {}]   ;;  %s413_s2 = inlined_call_operand.vmem [shape: f32[1,128], index: 2, kind: input, shape index: {}]   ;;  %s414_s3 = inlined_call_operand.vmem [shape: f32[1,128], index: 3, kind: input, shape index: {}]   ;;  %s415_s4 = inlined_call_operand.vmem [shape: f32[1,128], index: 4, kind: input, shape index: {}]   ;;  %s416_s5 = inlined_call_operand.hbm [shape: f32[16,128], index: 5, kind: output, shape index: {}]  }
   0x1   :  { %11 = vsyncpa [#allocation6], 0 }
   0x2   :  { %12 = vsyncpa [#allocation4], 0  ;;  %s349_s18 = smov [#allocation2]  }
   0x3   :  { %s18_s19 = sshll.u32 %s349_s18, 4  ;;  %s19_s19 = int_to_ptr.vmem [resolvable:$true] %s18_s19 }
   0x4   :  { %s291_s20 = scalar_lea.vmem %s19_s19, 256  ;;  %p296_p1 = scmp.lt.s32.totalorder %s19_s19, %s19_s19 }
   0x5   :  { %p292_p0 = scmp.ne.s32.totalorder %s19_s19, %s291_s20  ;;  %p297_p2 = scmp.lt.s32.totalorder %s291_s20, %s291_s20 }
   0x7   :  { %p298_p3 = por %p297_p2, %p296_p1 }
   0x9   :  { %p299_p4 = pnand %p298_p3, %p292_p0 }
   0xb   :  { %302 = shalt.err (!%p299_p4)
}
   0xc   :  { %s350_s21 = smov 128   ;;  %s351_s22 = smov 8  }
   0xd   :  { %24 = dma.hbm_to_vmem [thread:$0]  %s411_s0, 256, %s19_s19, [#allocation3], %s350_s21, %s350_s21, %s351_s22  }
   0xe   :  { %s352_s25 = smov [#allocation5]  }
   0xf   :  { %s30_s26 = sshll.u32 %s352_s25, 4  ;;  %s31_s26 = int_to_ptr.vmem [resolvable:$true] %s30_s26 }
  0x10   :  { %s311_s27 = scalar_lea.vmem %s31_s26, 2048  ;;  %p316_p6 = scmp.lt.s32.totalorder %s31_s26, %s31_s26 }
  0x11   :  { %p312_p5 = scmp.ne.s32.totalorder %s31_s26, %s311_s27  ;;  %p317_p7 = scmp.lt.s32.totalorder %s311_s27, %s311_s27 }
  0x13   :  { %p318_p8 = por %p317_p7, %p316_p6 }
  0x15   :  { %p319_p9 = pnand %p318_p8, %p312_p5 }
  0x17   :  { %322 = shalt.err (!%p319_p9)
}
  0x18   :  { %36 = dma.hbm_to_vmem [thread:$0]  %s412_s1, 2048, %s31_s26, [#allocation6], %s350_s21, %s350_s21, %s351_s22  }
  0x19   :  { %343 = dma.done.wait [#allocation3], 256  }
  0x1a   :  { %344 = vsyncadd [#allocation3], 4294967040 }
  0x1b   :  { %345 = dma.done.wait [#allocation6], 2048  }
  0x1c   :  { %346 = vsyncadd [#allocation6], 4294965248  ;;  %v66_v0 = vld [vmem:[#allocation5 + $0x78] sm:$0xff]  ;;  %v65_v1 = vld [vmem:[#allocation5 + $0x70] sm:$0xff]  ;;  %v153_v18 = vlaneseq  ;;  %s353_s8 = smov [#allocation7]  }
  0x1d   :  { %239 = vmatprep.subr.mxu0 %v66_v0  ;;  %v64_v2 = vld [vmem:[#allocation5 + $0x68] sm:$0xff]  ;;  %v63_v3 = vld [vmem:[#allocation5 + $0x60] sm:$0xff]  ;;  %v49_v4 = vld [vmem:[#allocation2] sm:$0xff]  ;;  %s205_s9 = sshll.u32 %s353_s8, 4  ;;  %s206_s9 = int_to_ptr.vmem [resolvable:$true] %s205_s9 }
  0x1e   :  { %240 = vmatpush3.msra.mxu0 %v66_v0  ;;  %v62_v5 = vld [vmem:[#allocation5 + $0x58] sm:$0xff]  ;;  %271 = vmatprep.mubr.f32.mxu0 %v49_v4  ;;  %v61_v6 = vld [vmem:[#allocation5 + $0x50] sm:$0xff]  ;;  %v60_v7 = vld [vmem:[#allocation5 + $0x48] sm:$0xff]  ;;  %v154_v22 = vand.u32 127, %v153_v18  ;;  %s323_s10 = scalar_lea.vmem %s206_s9, 256  ;;  %p328_p11 = scmp.lt.s32.totalorder %s206_s9, %s206_s9 }
  0x1f   :  { %241 = vmatprep.subr.mxu0 %v65_v1  ;;  %v59_v8 = vld [vmem:[#allocation5 + $0x40] sm:$0xff]  ;;  %v58_v9 = vld [vmem:[#allocation5 + $0x38] sm:$0xff]  ;;  %v57_v10 = vld [vmem:[#allocation5 + $0x30] sm:$0xff]  ;;  %p324_p10 = scmp.ne.s32.totalorder %s206_s9, %s323_s10  ;;  %p329_p12 = scmp.lt.s32.totalorder %s323_s10, %s323_s10 }
  0x20   :  { %242 = vmatpush3.msra.mxu0 %v65_v1  ;;  %v56_v11 = vld [vmem:[#allocation5 + $0x28] sm:$0xff]  ;;  %v55_v12 = vld [vmem:[#allocation5 + $0x20] sm:$0xff]  ;;  %v54_v13 = vld [vmem:[#allocation5 + $0x18] sm:$0xff]  ;;  %vm155_vm0 = vcmp.lt.s32.totalorder %v154_v22, 32 }
  0x21   :  { %243 = vmatprep.subr.mxu0 %v64_v2  ;;  %v53_v14 = vld [vmem:[#allocation5 + $0x10] sm:$0xff]  ;;  %v52_v15 = vld [vmem:[#allocation5 + $0x8] sm:$0xff]  ;;  %v51_v16 = vld [vmem:[#allocation5] sm:$0xff]  ;;  %p330_p13 = por %p329_p12, %p328_p11 }
  0x22   :  { %244 = vmatpush3.msra.mxu0 %v64_v2  ;;  %v50_v17 = vld [vmem:[#allocation2 + $0x8] sm:$0xff]  ;;  %v218_v20 = vld [vmem:[%s413_s2] ss:$0 sm:$0xff] }
  0x23   :  { %245 = vmatprep.subr.mxu0 %v63_v3  ;;  %v219_v46 = vld [vmem:[%s414_s3] ss:$0 sm:$0xff]  ;;  %p331_p0 = pnand %p330_p13, %p324_p10 }
  0x24   :  { %246 = vmatpush3.msra.mxu0 %v63_v3  ;;  %v220_v48 = vld [vmem:[%s415_s4] ss:$0 sm:$0xff] }
  0x25   :  { %247 = vmatprep.subr.mxu0 %v62_v5 }
  0x26   :  { %248 = vmatpush3.msra.mxu0 %v62_v5 }
  0x27   :  { %249 = vmatprep.subr.mxu0 %v61_v6 }
  0x28   :  { %250 = vmatpush3.msra.mxu0 %v61_v6 }
  0x29   :  { %251 = vmatprep.subr.mxu0 %v60_v7 }
  0x2a   :  { %252 = vmatpush3.msra.mxu0 %v60_v7 }
  0x2b   :  { %253 = vmatprep.subr.mxu0 %v59_v8 }
  0x2c   :  { %254 = vmatpush3.msra.mxu0 %v59_v8 }
  0x2d   :  { %255 = vmatprep.subr.mxu0 %v58_v9 }
  0x2e   :  { %256 = vmatpush3.msra.mxu0 %v58_v9 }
  0x2f   :  { %257 = vmatprep.subr.mxu0 %v57_v10 }
  0x30   :  { %258 = vmatpush3.msra.mxu0 %v57_v10 }
  0x31   :  { %259 = vmatprep.subr.mxu0 %v56_v11 }
  0x32   :  { %260 = vmatpush3.msra.mxu0 %v56_v11 }
  0x33   :  { %261 = vmatprep.subr.mxu0 %v55_v12 }
  0x34   :  { %262 = vmatpush3.msra.mxu0 %v55_v12 }
  0x35   :  { %263 = vmatprep.subr.mxu0 %v54_v13 }
  0x36   :  { %264 = vmatpush3.msra.mxu0 %v54_v13 }
  0x37   :  { %265 = vmatprep.subr.mxu0 %v53_v14 }
  0x38   :  { %266 = vmatpush3.msra.mxu0 %v53_v14 }
  0x39   :  { %267 = vmatprep.subr.mxu0 %v52_v15 }
  0x3a   :  { %268 = vmatpush3.msra.mxu0 %v52_v15 }
  0x3b   :  { %269 = vmatprep.subr.mxu0 %v51_v16 }
  0x3c   :  { %270 = vmatpush3.msra.mxu0 %v51_v16 }
  0x3d   :  { %272 = vmatmul.mubr.f32.vlgmr.msra.gmra.mxu0 %v50_v17 }
  0xfd   :  { %v273_v19 = vpop.f32.mrf.mxu0 }
  0xfe   :  { %v146_v23 = vadd.f32 %v273_v19, %v218_v20 }
  0xff   :  { %v140_v21 = vpop.f32.mrf.mxu0 }
 0x100   :  { %v141_v24 = vadd.f32 %v218_v20, %v140_v21  ;;  %v150_v27 = vadd.f32 %v146_v23, %v50_v17 }
 0x102   :  { %v149_v25 = vadd.f32 %v141_v24, %v49_v4  ;;  %v157_v28 = vsel %vm155_vm0, %v150_v27, 0.0 }
 0x104   :  { %v156_v26 = vsel %vm155_vm0, %v149_v25, 0.0 }
 0x105   :  { %158 = vadd.xlane.f32.xlu0 %v156_v26 }
 0x109   :  { %160 = vadd.xlane.f32.xlu0 %v157_v28 }
 0x18e   :  { %v159_v29 = vpop.xlane.xlu0 %158 }
 0x18f   :  { %v162_v30 = vmul.f32 0.03125, %v159_v29 }
 0x191   :  { %v164_v31 = vsub.f32 %v149_v25, %v162_v30 }
 0x192   :  { %v161_v32 = vpop.xlane.xlu0 %160 }
 0x193   :  { %v163_v33 = vmul.f32 0.03125, %v161_v32  ;;  %v166_v34 = vsel %vm155_vm0, %v164_v31, 0.0 }
 0x194   :  { %v168_v35 = vmul.f32 %v166_v34, %v166_v34 }
 0x195   :  { %v165_v36 = vsub.f32 %v150_v27, %v163_v33 }
 0x196   :  { %170 = vadd.xlane.f32.xlu1 %v168_v35 }
 0x197   :  { %v167_v37 = vsel %vm155_vm0, %v165_v36, 0.0 }
 0x198   :  { %v169_v38 = vmul.f32 %v167_v37, %v167_v37 }
 0x19a   :  { %172 = vadd.xlane.f32.xlu1 %v169_v38 }
 0x21f   :  { %v171_v39 = vpop.xlane.xlu1 %170 }
 0x220   :  { %v174_v40 = vmul.f32 0.03125, %v171_v39 }
 0x222   :  { %v176_v41 = vadd.f32 1e-05, %v174_v40 }
 0x223   :  { %v173_v42 = vpop.xlane.xlu1 %172 }
 0x224   :  { %279 = vrsqrt.f32 %v176_v41  ;;  %v175_v43 = vmul.f32 0.03125, %v173_v42 }
 0x226   :  { %v177_v44 = vadd.f32 1e-05, %v175_v43 }
 0x228   :  { %281 = vrsqrt.f32 %v177_v44 }
 0x231   :  { %v280_v45 = vpop.eup %279 }
 0x232   :  { %v180_v47 = vmul.f32 %v280_v45, %v166_v34 }
 0x234   :  { %v188_v49 = vmul.f32 %v219_v46, %v180_v47 }
 0x235   :  { %v282_v50 = vpop.eup %281 }
 0x236   :  { %v181_v51 = vmul.f32 %v282_v50, %v167_v37  ;;  %v196_v52 = vadd.f32 %v220_v48, %v188_v49 }
 0x238   :  { %v189_v53 = vmul.f32 %v219_v46, %v181_v51  ;;  %198 = vst [vmem:[#allocation7] sm:$0xff] %v196_v52 }
 0x23a   :  { %v197_v54 = vadd.f32 %v220_v48, %v189_v53 }
 0x23c   :  { %199 = vst [vmem:[#allocation7 + $0x8] sm:$0xff] %v197_v54 }
 0x23d   :  { %334 = shalt.err (!%p331_p0)
}
 0x23e   :  { %211 = dma.vmem_to_hbm [thread:$0]  %s206_s9, 256, %s416_s5, [#allocation4], %s350_s21, %s350_s21, %s351_s22  }
 0x23f   :  { %347 = dma.done.wait [#allocation4], 256  }
 0x240   :  { %348 = vsyncadd [#allocation4], 4294967040 }
 0x241   :  { %215 = vsyncpa [#allocation3], 1 }
 0x242   :  { %216 = vsyncpa [#allocation6], 1 }
 0x243   :  { %217 = vsyncpa [#allocation4], 1 }

</bundles_post_ra>
